<compile_context>
chip_gen: v7x
topology: tpu7x:2x2x1
jax: 0.10.0
libtpu: 0.0.40
codegen_flags: <defaults>
</compile_context>

<pallas_src>
import jax
import jax.numpy as jnp
from jax.experimental import pallas as pl
from jax.experimental.pallas import tpu as pltpu


EPS = 1e-6


def _feature_map(x):
    # elu(x) + 1  ==  where(x > 0, x + 1, exp(x))   (alpha = 1)
    return jnp.where(x > 0, x + 1.0, jnp.exp(x))


# --------------------------------------------------------------------------
# Phase 1: accumulate block-diagonal KV slab and Ksum row over S tiles.
# --------------------------------------------------------------------------
def _make_kv_kernel(S, s_tile, mxu_dtype, needs_s_mask):
    def kernel(mask_ref, k_ref, v_ref, kv_ref, ks_ref):
        # mask_ref: (HgD, HgM) f32 block-diag 0/1 (resident constant)
        # k_ref:    (1, s_tile, HgD)     v_ref: (1, s_tile, HgM)
        # kv_ref:   (1, 1, HgD, HgM) f32 output, revisited across s (accum)
        # ks_ref:   (1, 1, 1, HgD)   f32 output, revisited across s (accum)
        s = pl.program_id(2)

        @pl.when(s == 0)
        def _init():
            kv_ref[...] = jnp.zeros_like(kv_ref)
            ks_ref[...] = jnp.zeros_like(ks_ref)

        k_f = _feature_map(k_ref[0].astype(jnp.float32))      # (s_tile, HgD)
        v_t = v_ref[0]                                         # (s_tile, HgM)

        if needs_s_mask:
            # Last S tile is padded: padded K rows would contribute
            # elu(garbage)+1 != 0, so zero them (and V) explicitly.
            s0 = s * s_tile
            rk = jax.lax.broadcasted_iota(jnp.int32, k_f.shape, 0) + s0
            rv = jax.lax.broadcasted_iota(jnp.int32, v_t.shape, 0) + s0
            k_f = jnp.where(rk < S, k_f, 0.0)
            v_t = jnp.where(rv < S, v_t, jnp.zeros_like(v_t))

        # KV[i, j] += sum_s K[s, i] * V[s, j]; contract S directly (no
        # transposed copy of K).  Cross-head entries are zeroed once at the
        # end with the resident mask.
        kv_ref[0, 0] += jax.lax.dot_general(
            k_f.astype(mxu_dtype), v_t.astype(mxu_dtype),
            (((0,), (0,)), ((), ())),
            preferred_element_type=jnp.float32)

        # Ksum: cheap sublane (XLU) reduction, no MXU work.
        ks_ref[0, 0] += jnp.sum(k_f, axis=0, keepdims=True)    # (1, HgD)

        @pl.when(s == pl.num_programs(2) - 1)
        def _finish():
            kv_ref[0, 0] *= mask_ref[...]

    return kernel


# --------------------------------------------------------------------------
# Phase 2: per L tile, numerator / denominator matmuls and the output store.
# --------------------------------------------------------------------------
def _make_out_kernel(mxu_dtype, eps):
    def kernel(mask_ref, kv_ref, ks_ref, q_ref, o_ref):
        # mask_ref: (HgD, HgM) f32   kv_ref: (1, 1, HgD, HgM) f32
        # ks_ref:   (1, 1, 1, HgD) f32
        # q_ref:    (1, TL, HgD)     o_ref:  (1, TL, HgM)
        q_f = _feature_map(q_ref[0].astype(jnp.float32))        # (TL, HgD)

        # Numerator: per-head Q @ (K^T V) via the block-diagonal KV slab
        # (single lane-dense MXU matmul, unmasked lane-dense store later).
        num = jax.lax.dot_general(
            q_f.astype(mxu_dtype), kv_ref[0, 0].astype(mxu_dtype),
            (((1,), (0,)), ((), ())),
            preferred_element_type=jnp.float32)                 # (TL, HgM)

        # Denominator: (Q .* Ksum_row) @ block-diag mask == per-head Q.Ksum
        # replicated over each head's M lanes.  Kept in f32 for accuracy.
        # TODO(synk): for HgM > 128 this replicates across lanes on the MXU;
        # a (HgD, 128) mask + XLU lane-repeat of the reciprocal would halve it.
        den = jax.lax.dot_general(
            q_f * ks_ref[0, 0], mask_ref[...],
            (((1,), (0,)), ((), ())),
            preferred_element_type=jnp.float32) + eps           # (TL, HgM)

        # Padded (garbage) Q rows may produce Inf/NaN here; harmless, their
        # output rows are masked on store.  Exact reciprocal: kernel is not
        # VPU-bound, approx+NR not worth it.
        o_ref[0] = (num * pl.reciprocal(den, approx=False)).astype(o_ref.dtype)

    return kernel


# --------------------------------------------------------------------------
# Wrapper helpers.
# --------------------------------------------------------------------------
def _vmem_budget_bytes():
    """~75% of this chip's physical VMEM (v5e/v6e 128 MiB, v7x 64 MiB)."""
    cap = 64 * 1024 * 1024          # conservative fallback (v7x floor)
    try:
        info = pltpu.get_tpu_info()
        cap = int(getattr(info, "vmem_capacity_bytes", cap))
    except Exception:
        pass
    return (cap * 3) // 4


def _pick_head_group(H, D, M):
    """Heads per group: cap the block-diag slab at ~(256, 256) lanes while
    keeping per-group column slices 128-lane aligned; fall back to all heads
    (always correct) when no aligned divisor exists."""
    if H * max(D, M) <= 256:
        return H
    for hg in range(H, 0, -1):
        if H % hg:
            continue
        if hg * max(D, M) > 256:
            continue
        if (hg * D) % 128 == 0 and (hg * M) % 128 == 0:
            return hg
    return H


def _pick_tile(total, per_row_bytes, budget, cap=2048):
    """Tile rows: as large as a slice of the VMEM budget allows (fewer grid
    steps, bigger DMAs), multiple of 8, capped; full extent if it fits."""
    rows = int(budget // (4 * max(per_row_bytes, 1)))
    rows = max(8, min(cap, rows))
    rows = (rows // 8) * 8
    if total <= rows:
        return total
    return rows


def linear_attention(queries, keys, values, *, l_tile=None, s_tile=None,
                     eps=EPS, use_bf16_matmul=False):
    """queries: (N, L, H, D); keys: (N, S, H, D); values: (N, S, H, M)."""
    N, L, H, D = queries.shape
    _, S, _, M = values.shape
    HD, HM = H * D, H * M

    Hg = _pick_head_group(H, D, M)
    G = H // Hg
    HgD, HgM = Hg * D, Hg * M

    # Free (metadata-only) reshapes: (H, D)/(H, M) are contiguous trailing
    # dims, so no HBM transpose pass is generated.
    q2 = queries.reshape(N, L, HD)
    k2 = keys.reshape(N, S, HD)
    v2 = values.reshape(N, S, HM)

    budget = _vmem_budget_bytes()
    in_bytes = jnp.dtype(queries.dtype).itemsize
    if s_tile is None:
        s_tile = _pick_tile(S, (HgD + HgM) * in_bytes, budget)
    if l_tile is None:
        l_tile = _pick_tile(L, (HgD + HgM) * in_bytes, budget)
    grid_s = pl.cdiv(S, s_tile)
    grid_l = pl.cdiv(L, l_tile)

    mxu_dtype = (jnp.bfloat16
                 if (queries.dtype == jnp.bfloat16 or use_bf16_matmul)
                 else jnp.float32)

    # Block-diagonal head mask (grid-invariant): built once here, fed as a
    # tiny resident constant input — safe under megacore sharding.
    row_h = jnp.arange(HgD, dtype=jnp.int32) // D
    col_h = jnp.arange(HgM, dtype=jnp.int32) // M
    mask = (row_h[:, None] == col_h[None, :]).astype(jnp.float32)

    # ---------------- Phase 1: KV / Ksum build (stream K, V over S) --------
    kv_kernel = _make_kv_kernel(S, s_tile, mxu_dtype, S % s_tile != 0)
    kv, ksum = pl.pallas_call(
        kv_kernel,
        out_shape=(
            jax.ShapeDtypeStruct((N, G, HgD, HgM), jnp.float32),
            jax.ShapeDtypeStruct((N, G, 1, HgD), jnp.float32),
        ),
        grid_spec=pltpu.PrefetchScalarGridSpec(
            num_scalar_prefetch=0,
            grid=(N, G, grid_s),
            in_specs=[
                pl.BlockSpec((HgD, HgM), lambda n, g, s: (0, 0)),       # mask
                pl.BlockSpec((1, s_tile, HgD), lambda n, g, s: (n, s, g)),  # K tile
                pl.BlockSpec((1, s_tile, HgM), lambda n, g, s: (n, s, g)),  # V tile
            ],
            out_specs=(
                pl.BlockSpec((1, 1, HgD, HgM), lambda n, g, s: (n, g, 0, 0)),
                pl.BlockSpec((1, 1, 1, HgD), lambda n, g, s: (n, g, 0, 0)),
            ),
        ),
        compiler_params=pltpu.CompilerParams(
            dimension_semantics=("parallel", "parallel", "arbitrary"),
            vmem_limit_bytes=int(budget),
        ),
    )(mask, k2, v2)

    # ---------------- Phase 2: outputs over L tiles (all independent) ------
    out_kernel = _make_out_kernel(mxu_dtype, eps)
    out2 = pl.pallas_call(
        out_kernel,
        out_shape=jax.ShapeDtypeStruct((N, L, HM), queries.dtype),
        grid_spec=pltpu.PrefetchScalarGridSpec(
            num_scalar_prefetch=0,
            grid=(N, G, grid_l),
            in_specs=[
                pl.BlockSpec((HgD, HgM), lambda n, g, l: (0, 0)),        # mask
                pl.BlockSpec((1, 1, HgD, HgM), lambda n, g, l: (n, g, 0, 0)),  # KV
                pl.BlockSpec((1, 1, 1, HgD), lambda n, g, l: (n, g, 0, 0)),    # Ksum
                pl.BlockSpec((1, l_tile, HgD), lambda n, g, l: (n, l, g)),     # Q tile
            ],
            out_specs=pl.BlockSpec((1, l_tile, HgM), lambda n, g, l: (n, l, g)),
        ),
        compiler_params=pltpu.CompilerParams(
            # N and the head-group axis feed megacore sharding (v7x: 2 TCs
            # even when N == 1); the L axis keeps KV/Ksum resident.
            dimension_semantics=("parallel", "parallel", "arbitrary"),
            vmem_limit_bytes=int(budget),
        ),
    )(mask, kv, ksum, q2)

    return out2.reshape(N, L, H, M)


def linear_attention_ref(queries, keys, values):
    """Pure-JAX reference mirroring the PyTorch einsums."""
    Q = _feature_map(queries.astype(jnp.float32))
    K = _feature_map(keys.astype(jnp.float32))
    Vv = values.astype(jnp.float32)
    KV = jnp.einsum('nshd,nshm->nhmd', K, Vv)
    Z = 1.0 / (jnp.einsum('nlhd,nhd->nlh', Q, K.sum(axis=1)) + EPS)
    V = jnp.einsum('nlhd,nhmd,nlh->nlhm', Q, KV, Z)
    return V.astype(queries.dtype)


if __name__ == "__main__":
    key = jax.random.PRNGKey(0)
    kq, kk, kv = jax.random.split(key, 3)

    N, L, S, H, D, M = 2, 16, 8, 4, 32, 32
    queries = jax.random.normal(kq, (N, L, H, D), dtype=jnp.float32)
    keys = jax.random.normal(kk, (N, S, H, D), dtype=jnp.float32)
    values = jax.random.normal(kv, (N, S, H, M), dtype=jnp.float32)

    out = jax.block_until_ready(linear_attention(queries, keys, values))
    ref = linear_attention_ref(queries, keys, values)

    assert out.shape == (N, L, H, M), out.shape
    assert jnp.allclose(out, ref, atol=1e-4, rtol=1e-4), (
        float(jnp.max(jnp.abs(out - ref)))
    )
    print("KERNEL_OK")
</pallas_src>

<mosaic_0001>
module attributes {stable_mosaic.version = 11 : i64} {
  func.func @kernel(%arg0: i32, %arg1: i32, %arg2: i32, %arg3: memref<128x128xf32, #tpu.memory_space<vmem>>, %arg4: memref<1x8x128xf32, #tpu.memory_space<vmem>>, %arg5: memref<1x8x128xf32, #tpu.memory_space<vmem>>, %arg6: memref<1x1x128x128xf32, #tpu.memory_space<vmem>>, %arg7: memref<1x1x1x128xf32, #tpu.memory_space<vmem>>) attributes {dimension_semantics = [#tpu.dimension_semantics<parallel>, #tpu.dimension_semantics<parallel>, #tpu.dimension_semantics<arbitrary>], iteration_bounds = array<i64: 2, 1, 1>, scalar_prefetch = 0 : i64, scratch_operands = 0 : i64, tpu.core_type = #tpu.core_type<tc>, window_params = [{pipeline_mode = #tpu.pipeline_mode<synchronous>, transform_indices = @transform_0, window_bounds = array<i64: 128, 128>}, {transform_indices = @transform_1, window_bounds = array<i64: 1, 8, 128>}, {transform_indices = @transform_2, window_bounds = array<i64: 1, 8, 128>}, {transform_indices = @transform_3, window_bounds = array<i64: 1, 1, 128, 128>}, {transform_indices = @transform_4, window_bounds = array<i64: 1, 1, 1, 128>}]} {
    %c0_i32 = arith.constant 0 : i32
    %0 = arith.cmpi eq, %arg2, %c0_i32 : i32
    %1 = arith.extui %0 : i1 to i32
    %c0_i32_0 = arith.constant 0 : i32
    %2 = arith.cmpi ne, %1, %c0_i32_0 : i32
    scf.if %2 {
      %cst_27 = arith.constant 0.000000e+00 : f32
      %31 = vector.broadcast %cst_27 : f32 to vector<1x1x128x128xf32>
      %c0_28 = arith.constant 0 : index
      %c0_29 = arith.constant 0 : index
      %c0_30 = arith.constant 0 : index
      %c0_31 = arith.constant 0 : index
      %32 = vector.load %arg6[%c0_28, %c0_29, %c0_30, %c0_31] : memref<1x1x128x128xf32, #tpu.memory_space<vmem>>, vector<1x1x128x128xf32>
      tpu.vector_store %arg6[%c0_28, %c0_29, %c0_30, %c0_31], %31 {strides = array<i32>} : memref<1x1x128x128xf32, #tpu.memory_space<vmem>>, vector<1x1x128x128xf32>,
      %cst_32 = arith.constant 0.000000e+00 : f32
      %33 = vector.broadcast %cst_32 : f32 to vector<1x1x1x128xf32>
      %c0_33 = arith.constant 0 : index
      %c0_34 = arith.constant 0 : index
      %c0_35 = arith.constant 0 : index
      %c0_36 = arith.constant 0 : index
      %34 = vector.load %arg7[%c0_33, %c0_34, %c0_35, %c0_36] : memref<1x1x1x128xf32, #tpu.memory_space<vmem>>, vector<1x1x1x128xf32>
      tpu.vector_store %arg7[%c0_33, %c0_34, %c0_35, %c0_36], %33 {strides = array<i32>} : memref<1x1x1x128xf32, #tpu.memory_space<vmem>>, vector<1x1x1x128xf32>,
    } else {
    }
    %c0 = arith.constant 0 : index
    %c0_1 = arith.constant 0 : index
    %c0_2 = arith.constant 0 : index
    %3 = vector.load %arg4[%c0, %c0_1, %c0_2] : memref<1x8x128xf32, #tpu.memory_space<vmem>>, vector<1x8x128xf32>
    %4 = vector.shape_cast %3 : vector<1x8x128xf32> to vector<8x128xf32>
    %cst = arith.constant 0.000000e+00 : f32
    %5 = vector.broadcast %cst : f32 to vector<8x128xf32>
    %6 = arith.cmpf ogt, %4, %5 : vector<8x128xf32>
    %cst_3 = arith.constant 1.000000e+00 : f32
    %7 = vector.broadcast %cst_3 : f32 to vector<8x128xf32>
    %8 = arith.addf %4, %7 : vector<8x128xf32>
    %9 = math.exp %4 : vector<8x128xf32>
    %10 = arith.select %6, %8, %9 : vector<8x128xi1>, vector<8x128xf32>
    %c0_4 = arith.constant 0 : index
    %c0_5 = arith.constant 0 : index
    %c0_6 = arith.constant 0 : index
    %11 = vector.load %arg5[%c0_4, %c0_5, %c0_6] : memref<1x8x128xf32, #tpu.memory_space<vmem>>, vector<1x8x128xf32>
    %12 = vector.shape_cast %11 : vector<1x8x128xf32> to vector<8x128xf32>
    %c0_7 = arith.constant 0 : index
    %c0_8 = arith.constant 0 : index
    %c0_9 = arith.constant 0 : index
    %c0_10 = arith.constant 0 : index
    %13 = vector.load %arg6[%c0_7, %c0_8, %c0_9, %c0_10] : memref<1x1x128x128xf32, #tpu.memory_space<vmem>>, vector<1x1x128x128xf32>
    %14 = vector.shape_cast %13 : vector<1x1x128x128xf32> to vector<128x128xf32>
    %cst_11 = arith.constant dense<0.000000e+00> : vector<128x128xf32>
    %15 = tpu.matmul %10, %12, %cst_11 {dimension_numbers = #tpu.dot_dimension_numbers<[0], [0], [1], [1], [0, 1, 1, 1], [], []>} : vector<8x128xf32>, vector<8x128xf32>, vector<128x128xf32> -> vector<128x128xf32>
    %16 = arith.addf %14, %15 : vector<128x128xf32>
    %c0_12 = arith.constant 0 : index
    %c0_13 = arith.constant 0 : index
    %c0_14 = arith.constant 0 : index
    %c0_15 = arith.constant 0 : index
    %17 = vector.load %arg6[%c0_12, %c0_13, %c0_14, %c0_15] : memref<1x1x128x128xf32, #tpu.memory_space<vmem>>, vector<1x1x128x128xf32>
    %18 = vector.shape_cast %17 : vector<1x1x128x128xf32> to vector<128x128xf32>
    %19 = vector.shape_cast %16 : vector<128x128xf32> to vector<1x1x128x128xf32>
    tpu.vector_store %arg6[%c0_12, %c0_13, %c0_14, %c0_15], %19 {strides = array<i32>} : memref<1x1x128x128xf32, #tpu.memory_space<vmem>>, vector<1x1x128x128xf32>,
    %c0_16 = arith.constant 0 : index
    %c0_17 = arith.constant 0 : index
    %c0_18 = arith.constant 0 : index
    %c0_19 = arith.constant 0 : index
    %20 = vector.load %arg7[%c0_16, %c0_17, %c0_18, %c0_19] : memref<1x1x1x128xf32, #tpu.memory_space<vmem>>, vector<1x1x1x128xf32>
    %21 = vector.shape_cast %20 : vector<1x1x1x128xf32> to vector<1x128xf32>
    %cst_20 = arith.constant dense<0.000000e+00> : vector<128xf32>
    %22 = vector.multi_reduction <add>, %10, %cst_20 [0] : vector<8x128xf32> to vector<128xf32>
    %23 = vector.shape_cast %22 : vector<128xf32> to vector<1x128xf32>
    %24 = arith.addf %21, %23 : vector<1x128xf32>
    %c0_21 = arith.constant 0 : index
    %c0_22 = arith.constant 0 : index
    %c0_23 = arith.constant 0 : index
    %c0_24 = arith.constant 0 : index
    %25 = vector.load %arg7[%c0_21, %c0_22, %c0_23, %c0_24] : memref<1x1x1x128xf32, #tpu.memory_space<vmem>>, vector<1x1x1x128xf32>
    %26 = vector.shape_cast %25 : vector<1x1x1x128xf32> to vector<1x128xf32>
    %27 = vector.shape_cast %24 : vector<1x128xf32> to vector<1x1x1x128xf32>
    tpu.vector_store %arg7[%c0_21, %c0_22, %c0_23, %c0_24], %27 {strides = array<i32>} : memref<1x1x1x128xf32, #tpu.memory_space<vmem>>, vector<1x1x1x128xf32>,
    %c0_i32_25 = arith.constant 0 : i32
    %28 = arith.cmpi eq, %arg2, %c0_i32_25 : i32
    %29 = arith.extui %28 : i1 to i32
    %c0_i32_26 = arith.constant 0 : i32
    %30 = arith.cmpi ne, %29, %c0_i32_26 : i32
    scf.if %30 {
      %c0_27 = arith.constant 0 : index
      %c0_28 = arith.constant 0 : index
      %c0_29 = arith.constant 0 : index
      %c0_30 = arith.constant 0 : index
      %31 = vector.load %arg6[%c0_27, %c0_28, %c0_29, %c0_30] : memref<1x1x128x128xf32, #tpu.memory_space<vmem>>, vector<1x1x128x128xf32>
      %32 = vector.shape_cast %31 : vector<1x1x128x128xf32> to vector<128x128xf32>
      %c0_31 = arith.constant 0 : index
      %c0_32 = arith.constant 0 : index
      %33 = vector.load %arg3[%c0_31, %c0_32] : memref<128x128xf32, #tpu.memory_space<vmem>>, vector<128x128xf32>
      %34 = arith.mulf %32, %33 : vector<128x128xf32>
      %c0_33 = arith.constant 0 : index
      %c0_34 = arith.constant 0 : index
      %c0_35 = arith.constant 0 : index
      %c0_36 = arith.constant 0 : index
      %35 = vector.load %arg6[%c0_33, %c0_34, %c0_35, %c0_36] : memref<1x1x128x128xf32, #tpu.memory_space<vmem>>, vector<1x1x128x128xf32>
      %36 = vector.shape_cast %35 : vector<1x1x128x128xf32> to vector<128x128xf32>
      %37 = vector.shape_cast %34 : vector<128x128xf32> to vector<1x1x128x128xf32>
      tpu.vector_store %arg6[%c0_33, %c0_34, %c0_35, %c0_36], %37 {strides = array<i32>} : memref<1x1x128x128xf32, #tpu.memory_space<vmem>>, vector<1x1x128x128xf32>,
    } else {
    }
    return
  }
  func.func @transform_0(%arg0: i32, %arg1: i32, %arg2: i32) -> (i32, i32) {
    %c0_i32 = arith.constant 0 : i32
    %c0_i32_0 = arith.constant 0 : i32
    %c0_i32_1 = arith.constant 0 : i32
    return %c0_i32, %c0_i32_0 : i32, i32
  }
  func.func @transform_1(%arg0: i32, %arg1: i32, %arg2: i32) -> (i32, i32, i32) {
    %c0_i32 = arith.constant 0 : i32
    return %arg0, %arg2, %arg1 : i32, i32, i32
  }
  func.func @transform_2(%arg0: i32, %arg1: i32, %arg2: i32) -> (i32, i32, i32) {
    %c0_i32 = arith.constant 0 : i32
    return %arg0, %arg2, %arg1 : i32, i32, i32
  }
  func.func @transform_3(%arg0: i32, %arg1: i32, %arg2: i32) -> (i32, i32, i32, i32) {
    %c0_i32 = arith.constant 0 : i32
    %c0_i32_0 = arith.constant 0 : i32
    %c0_i32_1 = arith.constant 0 : i32
    return %arg0, %arg1, %c0_i32, %c0_i32_0 : i32, i32, i32, i32
  }
  func.func @transform_4(%arg0: i32, %arg1: i32, %arg2: i32) -> (i32, i32, i32, i32) {
    %c0_i32 = arith.constant 0 : i32
    %c0_i32_0 = arith.constant 0 : i32
    %c0_i32_1 = arith.constant 0 : i32
    return %arg0, %arg1, %c0_i32, %c0_i32_0 : i32, i32, i32, i32
  }
}

</mosaic_0001>

<bundles_post_ra>
// kernel: tpu_custom_call.1
= control target key start
LH: loop header
LB: loop body
LE: loop exit
PB: predicated region body
PF: predicated region fallthrough
CT: control target
= control target key end

     0   :  { %s1607_s0 = inlined_call_operand.hbm [shape: f32[128,128], index: 0, kind: input, shape index: {}]   ;;  %s1608_s1 = inlined_call_operand.hbm [shape: f32[2,8,128], index: 1, kind: input, shape index: {}]   ;;  %s1609_s2 = inlined_call_operand.hbm [shape: f32[2,8,128], index: 2, kind: input, shape index: {}]   ;;  %s1610_s3 = inlined_call_operand.hbm [shape: f32[2,1,128,128], index: 3, kind: output, shape index: {0}]   ;;  %s1611_s4 = inlined_call_operand.hbm [shape: f32[2,1,1,128], index: 4, kind: output, shape index: {1}]  }
   0x1   :  { %1617 = sst [smem:[#allocation15_spill]] %s1608_s1 }
   0x2   :  { %1618 = sst [smem:[#allocation16_spill]] %s1609_s2 }
   0x3   :  { %10 = vsyncpa [#allocation3], 0 }
   0x4   :  { %11 = vsyncpa [#allocation6], 0 }
   0x5   :  { %13 = vsyncpa [#allocation6 + $0x1], 0 }
   0x6   :  { %14 = vsyncpa [#allocation4], 0 }
   0x7   :  { %16 = vsyncpa [#allocation4 + $0x1], 0 }
   0x8   :  { %17 = vsyncpa [#allocation10], 0 }
   0x9   :  { %19 = vsyncpa [#allocation10 + $0x1], 0  ;;  %s1286_s15 = smov 0   ;;  %s1288_s16 = smov 0  }
   0xa   :  { %s1290_s17 = smov 0   ;;  %s1292_s18 = smov 0  }
   0xb   :  { %s1294_s19 = smov 0   ;;  %s1296_s20 = smov 0  }
   0xc LB: > { %s44_s21 = sadd.s32 1, %s1245_s19  ;;  %s76_s22 = sadd.s32 1, %s1237_s17  ;;  %s1249_s20 = sphi %s1296_s20, %s25_s20   ;;  %s1245_s19 = sphi %s1294_s19, %s1639_s19   ;;  %s1241_s18 = sphi %s1292_s18, %s1638_s18   ;;  %s1237_s17 = sphi %s1290_s17, %s1637_s17   ;;  %s1233_s16 = sphi %s1288_s16, %s1636_s16   ;;  %s1229_s15 = sphi %s1286_s15, %s1635_s15  }
   0xd   : > { %p46_p0 = scmp.ge.s32.totalorder %s44_s21, 2  ;;  %p83_p1 = scmp.ne.s32.totalorder %s1237_s17, %s1233_s16 }
   0xe   : > { %p84_p2 = scmp.eq.s32.totalorder %s1249_s20, 0  ;;  %p984_p5 = scmp.lt.s32.totalorder %s1249_s20, 2 }
   0xf   : > { %s1641_s21 = smov (%p46_p0, %s44_s21), 0  ;;  %s212_s24 = sand.u32 1, %s1249_s20  }
  0x10   : > { %p85_p4 = por %p84_p2, %p83_p1  ;;  %s69_s23 = ssub.s32 %s1245_s19, %s1641_s21 }
  0x11   : > { %p74_p6 = scmp.eq.s32.totalorder %s69_s23, 0  ;;  %s214_s25 = sand.u32 1, %s1237_s17  }
  0x12   : > { %s877_s26 = sshll.u32 %s1245_s19, 7  ;;  %s1336_s28 = sshll.u32 %s214_s25, 3 }
  0x13   : > { %s1334_s27 = scalar_select %p74_p6, %s1237_s17, %s76_s22  }
  0x14   : > { %s1619_s1 = sld [smem:[#allocation15_spill]]  ;;  %p1345_p7 = pnand %p984_p5, %p85_p4 }
  0x15   : > { %s216_s7 = scalar_lea.vmem [#allocation5], %s1336_s28  ;;  %s1352_s9 = scalar_lea.sflag [#allocation6], %s212_s24 }
  0x16   : > { %s225_s8 = sshll.u32 %s216_s7, 4  ;;  %p1045_p9 = pneg %p1345_p7  ;;  %s1350_s8 = int_to_ptr.vmem [resolvable:$true] %s225_s8 }
  0x1a   : > { %s1343_s5 = scalar_lea.hbm %s1619_s1, %s877_s26  ;;  %s1048_s13 = scalar_lea.hbm %s1619_s1, 256 }
  0x1b   : > { %s1043_s10 = scalar_lea.hbm %s1343_s5, 128  ;;  %p1049_p12 = scmp.lt.u32.totalorder %s1343_s5, %s1619_s1 }
  0x1c   : > { %p1044_p8 = scmp.ne.s32.totalorder %s1343_s5, %s1043_s10  ;;  %p1050_p13 = scmp.lt.u32.totalorder %s1048_s13, %s1043_s10 }
  0x1d   : > { %p1052_p2 = scmp.lt.u32.totalorder %s1043_s10, %s1343_s5 }
  0x1e   : > { %p1046_p10 = pnand %p1045_p9, %p1044_p8  ;;  %p1051_p0 = por %p1050_p13, %p1049_p12 }
  0x20   : > { %p1047_p11 = pneg %p1046_p10  ;;  %p1053_p4 = por %p1052_p2, %p1051_p0 }
  0x22   : > { %p1054_p5 = pnand %p1053_p4, %p1047_p11 }
  0x24   : > { %1057 = shalt.err (!%p1054_p5)
}
  0x25   : > { %s1058_s23 = scalar_lea.vmem %s1350_s8, 128  ;;  %s1251_s24 = smov [#allocation5]  }
  0x26   : > { %p1059_p6 = scmp.ne.s32.totalorder %s1350_s8, %s1058_s23  ;;  %s1063_s25 = sshll.u32 %s1251_s24, 4  ;;  %s1064_s25 = int_to_ptr.vmem [resolvable:$false] %s1063_s25 }
  0x27   : > { %s1065_s29 = scalar_lea.vmem %s1064_s25, 256  ;;  %p1066_p3 = scmp.lt.s32.totalorder %s1350_s8, %s1064_s25 }
  0x28   : > { %p1061_p8 = pnand %p1059_p6, %p1045_p9  ;;  %p1067_p12 = scmp.lt.s32.totalorder %s1065_s29, %s1058_s23 }
  0x2a   : > { %p1062_p10 = pneg %p1061_p8  ;;  %p1068_p13 = por %p1067_p12, %p1066_p3 }
  0x2c   : > { %p1069_p0 = pnand %p1068_p13, %p1062_p10 }
  0x2e   : > { %1072 = shalt.err (!%p1069_p0)
}
  0x2f   : > { %972 = dma.hbm_to_vmem [thread:$0]  (!%p1345_p7), %s1343_s5, 128, %s1350_s8, %s1352_s9  }
  0x30   : > { %s1381_s30 = sadd.s32 4294967295, %s1249_s20   ;;  %s872_s7 = sadd.s32 4294967294, %s1249_s20  }
  0x31   : > { %p89_p3 = scmp.ne.s32.totalorder %s1233_s16, %s1229_s15  ;;  %p1612_p11 = scmp.eq.s32.totalorder %s1381_s30, 0 }
  0x32   : > { %p145_p2 = scmp.eq.s32.totalorder %s1381_s30, 1  ;;  %p151_p4 = scmp.eq.s32.totalorder %s872_s7, 1 }
  0x33   : > { %p873_p5 = scmp.ge.s32.totalorder %s1249_s20, 1  ;;  %p1391_p6 = por %p1612_p11, %p89_p3 }
  0x34   : > { %p1398_p8 = por %p145_p2, %p83_p1  ;;  %p1402_p10 = por %p151_p4, %p89_p3 }
  0x35   : > { %s1621_s10 = scalar_select %p1391_p6, 1, 0 }
  0x36   : > { %s1622_s5 = scalar_select %p1398_p8, 1, 0 }
  0x37   : > { %s1623_s8 = scalar_select %p1402_p10, 1, 0 }
  0x38   : > { %p186_p12 = scmp.lt.s32.totalorder %s1249_s20, 3  ;;  %s1252_s12 = smov [#allocation2]  }
  0x39   : > { %s198_s13 = sshll.u32 %s1252_s12, 4  ;;  %s1625_s2 = sld [smem:[#allocation16_spill]]  ;;  %s1418_s13 = int_to_ptr.vmem [resolvable:$true] %s198_s13 }
  0x3a   : > { %p1407_p13 = pnand %p873_p5, %p186_p12  ;;  %s236_s24 = scalar_lea.vmem [#allocation7], %s1336_s28 }
  0x3b   : > { %s245_s25 = sshll.u32 %s236_s24, 4  ;;  %s246_s25 = int_to_ptr.vmem [resolvable:$true] %s245_s25 }
  0x3c   : > { %s1624_s11 = scalar_select %p1407_p13, 1, 0 }
  0x3d   : > { %p965_p1 = pneg %p1407_p13 }
  0x3f   : > { %s1416_s23 = scalar_lea.hbm %s1625_s2, %s877_s26  ;;  %p1425_p0 = pnand %p965_p1, %p1612_p11 }
  0x40   : > { %s1073_s7 = scalar_lea.hbm %s1416_s23, 128  ;;  %s1078_s14 = scalar_lea.hbm %s1625_s2, 256 }
  0x41   : > { %s1626_s29 = scalar_select %p1425_p0, 1, 0 }
  0x42   : > { %p1074_p3 = scmp.ne.s32.totalorder %s1416_s23, %s1073_s7  ;;  %p1079_p5 = scmp.lt.u32.totalorder %s1416_s23, %s1625_s2 }
  0x43   : > { %p1080_p12 = scmp.lt.u32.totalorder %s1078_s14, %s1073_s7  ;;  %p1082_p11 = scmp.lt.u32.totalorder %s1073_s7, %s1416_s23 }
  0x44   : > { %p1076_p2 = pnand %p1074_p3, %p1045_p9 }
  0x45   : > { %p1081_p1 = por %p1080_p12, %p1079_p5 }
  0x46   : > { %p1077_p4 = pneg %p1076_p2 }
  0x47   : > { %p1083_p10 = por %p1082_p11, %p1081_p1 }
  0x49   : > { %p1084_p8 = pnand %p1083_p10, %p1077_p4 }
  0x4b   : > { %1087 = shalt.err (!%p1084_p8)
}
  0x4c   : > { %s1088_s28 = scalar_lea.vmem %s246_s25, 128  ;;  %s1253_s24 = smov [#allocation7]  }
  0x4d   : > { %p1089_p6 = scmp.ne.s32.totalorder %s246_s25, %s1088_s28  ;;  %s1093_s26 = sshll.u32 %s1253_s24, 4  ;;  %s1094_s26 = int_to_ptr.vmem [resolvable:$false] %s1093_s26 }
  0x4e   : > { %s1095_s12 = scalar_lea.vmem %s1094_s26, 256  ;;  %p1096_p13 = scmp.lt.s32.totalorder %s246_s25, %s1094_s26 }
  0x4f   : > { %p1091_p3 = pnand %p1089_p6, %p1045_p9  ;;  %p1097_p0 = scmp.lt.s32.totalorder %s1095_s12, %s1088_s28 }
  0x51   : > { %p1092_p2 = pneg %p1091_p3  ;;  %p1098_p5 = por %p1097_p0, %p1096_p13 }
  0x53   : > { %p1099_p12 = pnand %p1098_p5, %p1092_p2 }
  0x55   : > { %1102 = shalt.err (!%p1099_p12)
}
  0x56   : > { %975 = dma.hbm_to_vmem [thread:$0]  (!%p1345_p7), %s1416_s23, 128, %s246_s25, %s1352_s9  }
  0x57   : > { %s1103_s14 = scalar_lea.hbm %s1607_s0, 2048  ;;  %p1627_p11 = scmp.ne.s32.totalorder %s1626_s29, 0 }
  0x58   : > { %p1104_p9 = scmp.ne.s32.totalorder %s1607_s0, %s1103_s14  ;;  %p1110_p13 = scmp.lt.u32.totalorder %s1103_s14, %s1607_s0 }
  0x59   : > { %p1105_p6 = pneg %p1627_p11 }
  0x5b   : > { %p1106_p8 = pnand %p1105_p6, %p1104_p9 }
  0x5d   : > { %p1107_p10 = pneg %p1106_p8 }
  0x5f   : > { %p1112_p0 = pnand %p1110_p13, %p1107_p10 }
  0x61   : > { %1115 = shalt.err (!%p1112_p0)
}
  0x62   : > { %s1116_s6 = scalar_lea.vmem %s1418_s13, 2048  ;;  %p1124_p3 = scmp.lt.s32.totalorder %s1418_s13, %s1418_s13 }
  0x63   : > { %p1117_p7 = scmp.ne.s32.totalorder %s1418_s13, %s1116_s6  ;;  %p1125_p2 = scmp.lt.s32.totalorder %s1116_s6, %s1116_s6 }
  0x65   : > { %p1119_p4 = pnand %p1117_p7, %p1105_p6  ;;  %p1126_p5 = por %p1125_p2, %p1124_p3 }
  0x67   : > { %p1120_p1 = pneg %p1119_p4 }
  0x69   : > { %p1127_p12 = pnand %p1126_p5, %p1120_p1 }
  0x6b   : > { %1130 = shalt.err (!%p1127_p12)
}
  0x6c   : > { %s1254_s2 = smov 128   ;;  %s1255_s9 = smov 8  }
  0x6d   : > { %968 = dma.hbm_to_vmem [thread:$0]  (!%p1627_p11), %s1607_s0, 2048, %s1418_s13, [#allocation3], %s1254_s2, %s1254_s2, %s1255_s9  }
  0x6e   : > { %p1628_p9 = scmp.ne.s32.totalorder %s1624_s11, 0 }
  0x6f   : > { %p1629_p6 = scmp.eq.s32.totalorder (!%p1628_p9), %s1381_s30, 0 }
  0x70   : > { %254 = sbr.rel (%p1628_p9) target bundleno = 559 (0x22f), region = 32 }
  0x77   : > { %1212 = dma.done.wait (%p1629_p6), [#allocation3], 2048   ;;  %p1630_p8 = pmov %p1629_p6 }
  0x78   : > { %s260_s26 = sand.u32 1, %s1381_s30   ;;  %s1478_s12 = sand.u32 1, %s1233_s16  }
  0x79   : > { %1214 = vsyncadd (%p1630_p8), [#allocation3], 4294965248  ;;  %s882_s29 = sshll.u32 %s1478_s12, 3  ;;  %s261_s1 = scalar_lea.sflag [#allocation6], %s260_s26 }
  0x7a   : > { %s264_s7 = scalar_lea.vmem [#allocation5], %s882_s29  ;;  %p1631_p11 = scmp.ne.s32.totalorder %s1621_s10, 0 }
  0x7c   : > { %1216 = dma.done.wait (%p1631_p11), %s261_s1, 256  }
  0x7d   : > { %1218 = vsyncadd (%p1631_p11), %s261_s1, 4294967040  ;;  %s1486_s11 = scalar_lea.vmem [#allocation9], %s1478_s12  ;;  %v1256_v0 = vmov 0.0   ;;  %v328_v1 = vld [vmem:[%s264_s7] sm:$0xff]  ;;  %s273_s30 = scalar_lea.vmem [#allocation7], %s882_s29  ;;  %vm383_vm1 = vcmask 64512  }
  0x7e   : > { %327 = vst [vmem:[%s1486_s11] sm:$0x1] %v1256_v0  ;;  %v331_v2 = vmul.f32 1.442695, %v328_v1  ;;  %v330_v3 = vadd.f32 1.0, %v328_v1  ;;  %vm329_vm0 = vcmp.gt.f32.partialorder %v328_v1, 0.0  ;;  %v334_v8 = vld [vmem:[%s273_s30] sm:$0xff] }
  0x7f   : > { %925 = vmatprep.subr.mxu0 %v334_v8  ;;  %951 = vmatprep.subr.mxu1 %v334_v8  ;;  %s904_s10 = sshll.u32 %s1241_s18, 4  ;;  %s722_s13 = sshll.u32 %s1486_s11, 4  ;;  %s723_s13 = int_to_ptr.vmem [resolvable:$true] %s722_s13 }
  0x80   : > { %1041 = vpow2.f32 %v331_v2  ;;  %926 = vmatpush3.msra.mxu0 %v334_v8  ;;  %952 = vmatpush3.msra.mxu1 %v334_v8  ;;  %s1512_s28 = scalar_lea.hbm %s1611_s4, %s904_s10  ;;  %s691_s24 = scalar_lea.sflag [#allocation10], %s1478_s12 }
  0x81   : > { %s1131_s6 = scalar_lea.vmem %s723_s13, 16  ;;  %p1632_p13 = scmp.ne.s32.totalorder %s1622_s5, 0 }
  0x82   : > { %p1132_p10 = scmp.ne.s32.totalorder %s723_s13, %s1131_s6  ;;  %s1257_s2 = smov [#allocation9]  }
  0x83   : > { %s1135_s9 = sshll.u32 %s1257_s2, 4  ;;  %s1136_s9 = int_to_ptr.vmem [resolvable:$false] %s1135_s9 }
  0x84   : > { %p1133_p0 = pnand %p1132_p10, %p1632_p13  ;;  %s1137_s23 = scalar_lea.vmem %s1136_s9, 32 }
  0x85   : > { %v609_v12 = vld [vmem:[%s1486_s11] sm:$0x1]  ;;  %p1138_p4 = scmp.lt.s32.totalorder %s723_s13, %s1136_s9  ;;  %p1139_p1 = scmp.lt.s32.totalorder %s1137_s23, %s1131_s6 }
  0x86   : > { %p1134_p7 = pneg %p1133_p0 }
  0x87   : > { %p1140_p3 = por %p1139_p1, %p1138_p4 }
  0x89   : > { %p1141_p2 = pnand %p1140_p3, %p1134_p7 }
  0x8a   : > { %v1042_v4 = vpop.eup %1041 }
  0x8b   : > { %v333_v5 = vsel %vm329_vm0, %v330_v3, %v1042_v4 }
  0x8c   : > { %351 = vxpose.xlu0.b32.start.end [1/1] (short) %v333_v5, 128  ;;  %v610_v6 = vrot.slane %v333_v5, 4 }
  0x8e   : > { %v611_v7 = vadd.f32 %v610_v6, %v333_v5 }
  0x90   : > { %v612_v9 = vrot.slane %v611_v7, 2 }
  0x92   : > { %v613_v10 = vadd.f32 %v612_v9, %v611_v7 }
  0x94   : > { %v614_v11 = vrot.slane %v613_v10, 1 }
  0x96   : > { %v615_v13 = vadd.f32 %v614_v11, %v613_v10 }
  0x98   : > { %v616_v14 = vadd.f32 %v615_v13, %v609_v12 }
  0x9a   : > { %617 = vst [vmem:[%s1486_s11] sm:$0x1] %v616_v14 }
 0x10c   : > { %v367_v15 = vpop.trf.xlu0 }
 0x10d   : > { %927 = vmatprep.mubr.msk.f32.mxu0 %vm383_vm1, %v367_v15 }
 0x110   : > { %v368_v16 = vpop.trf.xlu0 }
 0x111   : > { %928 = vmatmul.mubr.msk.f32.vlgmr.msra.gmra.mrb[0].mxu0 %vm383_vm1, %v368_v16 }
 0x114   : > { %v369_v17 = vpop.trf.xlu0 }
 0x115   : > { %930 = vmatprep.mubr.msk.f32.mxu0 %vm383_vm1, %v369_v17 }
 0x118   : > { %v370_v18 = vpop.trf.xlu0 }
 0x119   : > { %931 = vmatmul.mubr.msk.f32.gmra.mrb[2].mxu0 %vm383_vm1, %v370_v18 }
 0x11c   : > { %v371_v19 = vpop.trf.xlu0 }
 0x11d   : > { %933 = vmatprep.mubr.msk.f32.mxu0 %vm383_vm1, %v371_v19 }
 0x120   : > { %v372_v20 = vpop.trf.xlu0 }
 0x121   : > { %934 = vmatmul.mubr.msk.f32.gmra.mrb[4].mxu0 %vm383_vm1, %v372_v20 }
 0x124   : > { %v373_v21 = vpop.trf.xlu0 }
 0x125   : > { %936 = vmatprep.mubr.msk.f32.mxu0 %vm383_vm1, %v373_v21 }
 0x128   : > { %v374_v22 = vpop.trf.xlu0 }
 0x129   : > { %937 = vmatmul.mubr.msk.f32.gmra.mrb[6].mxu0 %vm383_vm1, %v374_v22 }
 0x12c   : > { %v375_v23 = vpop.trf.xlu0 }
 0x12d   : > { %939 = vmatprep.mubr.msk.f32.mxu1 %vm383_vm1, %v375_v23 }
 0x130   : > { %v376_v24 = vpop.trf.xlu0 }
 0x131   : > { %940 = vmatmul.mubr.msk.f32.vlgmr.msra.gmra.mrb[0].mxu1 %vm383_vm1, %v376_v24 }
 0x134   : > { %v377_v25 = vpop.trf.xlu0 }
 0x135   : > { %942 = vmatprep.mubr.msk.f32.mxu1 %vm383_vm1, %v377_v25 }
 0x138   : > { %v378_v26 = vpop.trf.xlu0 }
 0x139   : > { %943 = vmatmul.mubr.msk.f32.gmra.mrb[2].mxu1 %vm383_vm1, %v378_v26 }
 0x13c   : > { %v379_v27 = vpop.trf.xlu0 }
 0x13d   : > { %945 = vmatprep.mubr.msk.f32.mxu1 %vm383_vm1, %v379_v27 }
 0x140   : > { %v380_v28 = vpop.trf.xlu0 }
 0x141   : > { %946 = vmatmul.mubr.msk.f32.gmra.mrb[4].mxu1 %vm383_vm1, %v380_v28 }
 0x144   : > { %v381_v29 = vpop.trf.xlu0 }
 0x145   : > { %948 = vmatprep.mubr.msk.f32.mxu1 %vm383_vm1, %v381_v29 }
 0x148   : > { %v382_v30 = vpop.trf.xlu0 }
 0x149   : > { %949 = vmatmul.mubr.msk.f32.gmra.mrb[6].mxu1 %vm383_vm1, %v382_v30 }
 0x14a   : > { %1144 = shalt.err (!%p1141_p2)
}
 0x14b   : > { %s1145_s25 = scalar_lea.hbm %s1512_s28, 16  ;;  %s1149_s1 = scalar_lea.hbm %s1611_s4, 32 }
 0x14c   : > { %p1146_p5 = scmp.ne.s32.totalorder %s1512_s28, %s1145_s25  ;;  %p1150_p6 = scmp.lt.u32.totalorder %s1512_s28, %s1611_s4 }
 0x14d   : > { %p1151_p8 = scmp.lt.u32.totalorder %s1149_s1, %s1145_s25  ;;  %p1153_p10 = scmp.lt.u32.totalorder %s1145_s25, %s1512_s28 }
 0x14e   : > { %p1147_p12 = pnand %p1146_p5, %p1632_p13 }
 0x14f   : > { %p1152_p11 = por %p1151_p8, %p1150_p6 }
 0x150   : > { %p1148_p9 = pneg %p1147_p12 }
 0x151   : > { %p1154_p0 = por %p1153_p10, %p1152_p11 }
 0x153   : > { %p1155_p7 = pnand %p1154_p0, %p1148_p9 }
 0x155   : > { %1158 = shalt.err (!%p1155_p7)
}
 0x156   : > { %962 = dma.vmem_to_hbm [thread:$0]  (%p1632_p13), %s723_s13, 16, %s1512_s28, %s691_s24   ;;  %v638_v32 = vld [vmem:[#allocation2 + $0x8] sm:$0xff]  ;;  %v637_v34 = vld [vmem:[#allocation2] sm:$0xff]  ;;  %v640_v38 = vld [vmem:[#allocation2 + $0x18] sm:$0xff] }
 0x157   : > { %s884_s30 = sshll.u32 %s1478_s12, 7  ;;  %v639_v40 = vld [vmem:[#allocation2 + $0x10] sm:$0xff]  ;;  %v642_v44 = vld [vmem:[#allocation2 + $0x28] sm:$0xff]  ;;  %v641_v46 = vld [vmem:[#allocation2 + $0x20] sm:$0xff]  ;;  %s907_s13 = sshll.u32 %s1241_s18, 11 }
 0x158   : > { %s1533_s10 = scalar_lea.vmem [#allocation8], %s884_s30  ;;  %v644_v50 = vld [vmem:[#allocation2 + $0x38] sm:$0xff]  ;;  %v643_v52 = vld [vmem:[#allocation2 + $0x30] sm:$0xff]  ;;  %v646_v56 = vld [vmem:[#allocation2 + $0x48] sm:$0xff]  ;;  %s1554_s24 = scalar_lea.hbm %s1610_s3, %s907_s13 }
 0x159   : > { %v645_v58 = vld [vmem:[#allocation2 + $0x40] sm:$0xff]  ;;  %v648_v62 = vld [vmem:[#allocation2 + $0x58] sm:$0xff]  ;;  %v647_v0 = vld [vmem:[#allocation2 + $0x50] sm:$0xff]  ;;  %s705_s14 = sshll.u32 %s1533_s10, 4  ;;  %s686_s6 = scalar_lea.sflag [#allocation4], %s1478_s12  ;;  %s1556_s14 = int_to_ptr.vmem [resolvable:$true] %s705_s14 }
 0x15a   : > { %v650_v4 = vld [vmem:[#allocation2 + $0x68] sm:$0xff]  ;;  %v649_v6 = vld [vmem:[#allocation2 + $0x60] sm:$0xff]  ;;  %v652_v10 = vld [vmem:[#allocation2 + $0x78] sm:$0xff]  ;;  %s1159_s2 = scalar_lea.vmem %s1556_s14, 2048  ;;  %s1258_s18 = smov [#allocation8]  }
 0x15b   : > { %v651_v12 = vld [vmem:[#allocation2 + $0x70] sm:$0xff]  ;;  %p1160_p4 = scmp.ne.s32.totalorder %s1556_s14, %s1159_s2  ;;  %s1163_s9 = sshll.u32 %s1258_s18, 4  ;;  %s1164_s9 = int_to_ptr.vmem [resolvable:$false] %s1163_s9 }
 0x15c   : > { %s1165_s23 = scalar_lea.vmem %s1164_s9, 4096  ;;  %p1166_p2 = scmp.lt.s32.totalorder %s1556_s14, %s1164_s9 }
 0x15d   : > { %p1161_p1 = pnand %p1160_p4, %p1632_p13  ;;  %p1167_p5 = scmp.lt.s32.totalorder %s1165_s23, %s1159_s2 }
 0x15f   : > { %p1162_p3 = pneg %p1161_p1  ;;  %p1168_p12 = por %p1167_p5, %p1166_p2 }
 0x161   : > { %p1169_p9 = pnand %p1168_p12, %p1162_p3 }
 0x1e4   : > { %v929_v31 = vpop.f32.mrb[0].mxu0 }
 0x1e5   : > { %v498_v33 = vpop.f32.mrb[1].mxu0  ;;  %v654_v35 = vmul.f32 %v929_v31, %v638_v32 }
 0x1e6   : > { %v653_v36 = vmul.f32 %v637_v34, %v498_v33 }
 0x1e7   : > { %670 = vst [vmem:[%s1533_s10 + $0x8] sm:$0xff] %v654_v35 }
 0x1e8   : > { %669 = vst [vmem:[%s1533_s10] sm:$0xff] %v653_v36 }
 0x1ec   : > { %v932_v37 = vpop.f32.mrb[2].mxu0 }
 0x1ed   : > { %v508_v39 = vpop.f32.mrb[3].mxu0  ;;  %v656_v41 = vmul.f32 %v932_v37, %v640_v38 }
 0x1ee   : > { %v655_v42 = vmul.f32 %v639_v40, %v508_v39 }
 0x1ef   : > { %672 = vst [vmem:[%s1533_s10 + $0x18] sm:$0xff] %v656_v41 }
 0x1f0   : > { %671 = vst [vmem:[%s1533_s10 + $0x10] sm:$0xff] %v655_v42 }
 0x1f4   : > { %v935_v43 = vpop.f32.mrb[4].mxu0 }
 0x1f5   : > { %v518_v45 = vpop.f32.mrb[5].mxu0  ;;  %v658_v47 = vmul.f32 %v935_v43, %v642_v44 }
 0x1f6   : > { %v657_v48 = vmul.f32 %v641_v46, %v518_v45 }
 0x1f7   : > { %674 = vst [vmem:[%s1533_s10 + $0x28] sm:$0xff] %v658_v47 }
 0x1f8   : > { %673 = vst [vmem:[%s1533_s10 + $0x20] sm:$0xff] %v657_v48 }
 0x1fc   : > { %v938_v49 = vpop.f32.mrb[6].mxu0 }
 0x1fd   : > { %v528_v51 = vpop.f32.mrb[7].mxu0  ;;  %v660_v53 = vmul.f32 %v938_v49, %v644_v50 }
 0x1fe   : > { %v659_v54 = vmul.f32 %v643_v52, %v528_v51 }
 0x1ff   : > { %676 = vst [vmem:[%s1533_s10 + $0x38] sm:$0xff] %v660_v53 }
 0x200   : > { %675 = vst [vmem:[%s1533_s10 + $0x30] sm:$0xff] %v659_v54 }
 0x204   : > { %v941_v55 = vpop.f32.mrb[0].mxu1 }
 0x205   : > { %v538_v57 = vpop.f32.mrb[1].mxu1  ;;  %v662_v59 = vmul.f32 %v941_v55, %v646_v56 }
 0x206   : > { %v661_v60 = vmul.f32 %v645_v58, %v538_v57 }
 0x207   : > { %678 = vst [vmem:[%s1533_s10 + $0x48] sm:$0xff] %v662_v59 }
 0x208   : > { %677 = vst [vmem:[%s1533_s10 + $0x40] sm:$0xff] %v661_v60 }
 0x20c   : > { %v944_v61 = vpop.f32.mrb[2].mxu1 }
 0x20d   : > { %v548_v63 = vpop.f32.mrb[3].mxu1  ;;  %v664_v1 = vmul.f32 %v944_v61, %v648_v62 }
 0x20e   : > { %v663_v2 = vmul.f32 %v647_v0, %v548_v63 }
 0x20f   : > { %680 = vst [vmem:[%s1533_s10 + $0x58] sm:$0xff] %v664_v1 }
 0x210   : > { %679 = vst [vmem:[%s1533_s10 + $0x50] sm:$0xff] %v663_v2 }
 0x214   : > { %v947_v3 = vpop.f32.mrb[4].mxu1 }
 0x215   : > { %v558_v5 = vpop.f32.mrb[5].mxu1  ;;  %v666_v7 = vmul.f32 %v947_v3, %v650_v4 }
 0x216   : > { %v665_v8 = vmul.f32 %v649_v6, %v558_v5 }
 0x217   : > { %682 = vst [vmem:[%s1533_s10 + $0x68] sm:$0xff] %v666_v7 }
 0x218   : > { %681 = vst [vmem:[%s1533_s10 + $0x60] sm:$0xff] %v665_v8 }
 0x21c   : > { %v950_v9 = vpop.f32.mrb[6].mxu1 }
 0x21d   : > { %v568_v11 = vpop.f32.mrb[7].mxu1  ;;  %v668_v13 = vmul.f32 %v950_v9, %v652_v10 }
 0x21e   : > { %v667_v14 = vmul.f32 %v651_v12, %v568_v11 }
 0x21f   : > { %684 = vst [vmem:[%s1533_s10 + $0x78] sm:$0xff] %v668_v13 }
 0x220   : > { %683 = vst [vmem:[%s1533_s10 + $0x70] sm:$0xff] %v667_v14 }
 0x221   : > { %1172 = shalt.err (!%p1169_p9)
}
 0x222   : > { %s1173_s25 = scalar_lea.hbm %s1554_s24, 2048  ;;  %s1177_s1 = scalar_lea.hbm %s1610_s3, 4096 }
 0x223   : > { %p1174_p6 = scmp.ne.s32.totalorder %s1554_s24, %s1173_s25  ;;  %p1178_p10 = scmp.lt.u32.totalorder %s1554_s24, %s1610_s3 }
 0x224   : > { %p1179_p0 = scmp.lt.u32.totalorder %s1177_s1, %s1173_s25  ;;  %p1181_p4 = scmp.lt.u32.totalorder %s1173_s25, %s1554_s24 }
 0x225   : > { %p1175_p8 = pnand %p1174_p6, %p1632_p13 }
 0x226   : > { %p1180_p7 = por %p1179_p0, %p1178_p10 }
 0x227   : > { %p1176_p11 = pneg %p1175_p8 }
 0x228   : > { %p1182_p1 = por %p1181_p4, %p1180_p7 }
 0x22a   : > { %p1183_p3 = pnand %p1182_p1, %p1176_p11 }
 0x22c   : > { %1186 = shalt.err (!%p1183_p3)
}
 0x22d   : > { %s1259_s30 = smov 128   ;;  %s1260_s10 = smov 8  }
 0x22e   : > { %961 = dma.vmem_to_hbm [thread:$0]  (%p1632_p13), %s1556_s14, 2048, %s1554_s24, %s686_s6, %s1259_s30, %s1259_s30, %s1260_s10  }
 0x22f PF: > { %s734_s13 = sand.u32 1, %s1229_s15   ;;  %p1633_p2 = scmp.ne.s32.totalorder %s1623_s8, 0 }
 0x230   : > { %p1634_p5 = scmp.ge.s32.totalorder %s1249_s20, 2  ;;  %s735_s22 = scalar_lea.sflag [#allocation4], %s734_s13 }
 0x232   : > { %p977_p12 = pnand %p1634_p5, %p1633_p2 }
 0x234   : > { %1220 = dma.done.wait (!%p977_p12), %s735_s22, 2048  }
 0x235   : > { %1222 = vsyncadd (!%p977_p12), %s735_s22, 4294965248  ;;  %s744_s28 = scalar_lea.sflag [#allocation10], %s734_s13 }
 0x236   : > { %1224 = dma.done.wait (!%p977_p12), %s744_s28, 16  }
 0x237   : > { %1226 = vsyncadd (!%p977_p12), %s744_s28, 4294967280  ;;  %s25_s20 = sadd.s32 1, %s1249_s20   ;;  %s1635_s15 = smov %s1233_s16 }
 0x238   : > { %p22_p9 = scmp.ge.s32.totalorder %s25_s20, 4   ;;  %s1636_s16 = smov %s1237_s17 }
 0x239   : > { %s1637_s17 = smov %s1334_s27  ;;  %s1638_s18 = smov %s1245_s19 }
 0x23a   : > { %s1639_s19 = smov %s1641_s21  ;;  %24 = sbr.rel (!%p22_p9) target bundleno = 12 (0xc), region = 118 }
 0x241   :  { %748 = vsyncpa [#allocation3], 1 }
 0x242   :  { %750 = vsyncpa [#allocation3 + $0x1], 1 }
 0x243   :  { %751 = vsyncpa [#allocation6], 1 }
 0x244   :  { %753 = vsyncpa [#allocation6 + $0x1], 1 }
 0x245   :  { %754 = vsyncpa [#allocation4], 1 }
 0x246   :  { %756 = vsyncpa [#allocation4 + $0x1], 1 }
 0x247   :  { %757 = vsyncpa [#allocation10], 1 }
 0x248   :  { %759 = vsyncpa [#allocation10 + $0x1], 1 }

</bundles_post_ra>
